<compile_context>
chip_gen: v5e
topology: v5e:2x2
jax: 0.10.0
libtpu: 0.0.40
codegen_flags: <defaults>
</compile_context>

<pallas_src>
import functools

import jax
import jax.numpy as jnp
from jax.experimental import pallas as pl
from jax.experimental.pallas import tpu as pltpu


def _choose_hc(H):
    """H-chunk for the reduction grid axis: divides H exactly, <= 512 lanes."""
    if H <= 512 or H % 128 != 0:
        return H
    for d in (512, 384, 256, 128):
        if H % d == 0:
            return d
    return H  # TODO(synk): H > 512 and not a multiple of 128 -> single big chunk.


def flatsim_kernel(x_ref, y_ref, c_ref, w3_ref, s_ref, mask_ref, out_ref, acc_ref, *, lc):
    # grid = (B tiles, L tiles, H chunks); H is the innermost ("arbitrary") axis.
    h_step = pl.program_id(2)

    @pl.when(h_step == 0)
    def _():
        acc_ref[...] = jnp.zeros_like(acc_ref)

    tb, tl, hc = x_ref.shape
    # Hoist the per-batch broadcasts out of the L loop (JAX does not CSE them).
    ys = y_ref[...][:, None, :]                        # (TB, 1, HC) f32
    cs = c_ref[...][:, None, :]                        # (TB, 1, HC) = w0 + w2*y
    ws = w3_ref[...][None, :, :]                       # (1,  1, HC)

    # Chunk along L so f32 temporaries stay ~2 MiB instead of tile-sized.
    for l0 in range(0, tl, lc):
        l1 = min(l0 + lc, tl)
        xs = x_ref[:, l0:l1, :].astype(jnp.float32)    # (TB, LC, HC)
        t = xs * cs + jnp.abs(xs - ys) * ws
        acc_ref[:, l0:l1] = acc_ref[:, l0:l1] + jnp.sum(t, axis=-1)

    @pl.when(h_step == pl.num_programs(2) - 1)
    def _():
        scores = acc_ref[...] + s_ref[...]             # (TB, TL) + (TB, 1)
        out_ref[...] = jnp.where(mask_ref[...] != 0, -jnp.inf, scores)


@functools.partial(jax.jit, static_argnames=("target_tile_bytes", "tl"))
def flatsim_v2(x, y, x_mask, weight, bias, *, target_tile_bytes=8 * 1024 * 1024, tl=None):
    """x: (B, L, H), y: (B, H), x_mask: (B, L) bool, weight: (1, 4H), bias: (1,)."""
    B, L, H = x.shape

    # --- tiny per-batch precompute, O(B*H) (negligible vs. the O(B*L*H) stream) ---
    w4 = weight.reshape(4, H).astype(jnp.float32)      # rows: [x, y, x*y, |x-y|]
    w0, w1, w2, w3 = w4[0], w4[1], w4[2], w4[3]
    y32 = y.astype(jnp.float32)
    c = w0[None, :] + w2[None, :] * y32                # (B, H)
    s = (jnp.sum(y32 * w1[None, :], axis=-1, keepdims=True)
         + bias.reshape(1, 1).astype(jnp.float32))     # (B, 1)
    w3r = w3.reshape(1, H)
    mask_i8 = x_mask.astype(jnp.int8)                  # O(B*L) bytes; 4x less mask DMA

    # --- tiling -----------------------------------------------------------------
    TB = B if B < 8 else 8                             # sublane-aligned batch rows
    HC = _choose_hc(H)
    nh = H // HC
    x_item = x.dtype.itemsize

    if tl is None:
        tl = (target_tile_bytes // (TB * HC * x_item)) // 128 * 128
        tl = max(128, tl)
    else:
        tl = max(128, (tl // 128) * 128)
    if tl >= L:
        tl = L                                         # single full-L tile (allowed)
        if B <= TB and L >= 256:
            # keep >= 2 parallel tiles so both v7x TensorCores get work
            tl = pl.cdiv(pl.cdiv(L, 2), 128) * 128

    nb = pl.cdiv(B, TB)
    nl = pl.cdiv(L, tl)
    grid = (nb, nl, nh)

    # In-kernel L chunk: keep f32 temporaries around ~2 MiB.
    lc = (2 * 1024 * 1024) // (TB * HC * 4)
    lc = max(128, (lc // 128) * 128)
    lc = min(lc, tl)

    # --- VMEM budget: 2x x-tile (double buffer) + small resident blocks + scratch
    #     + headroom for elementwise f32 temporaries, ~30% margin. -----------------
    x_tile = TB * tl * HC * x_item
    small = 2 * TB * HC * 4 + HC * 4 + TB * 4          # y + c + w3 + s (per buffer)
    io = TB * tl * (1 + 4)                             # mask (i8) + out (f32), per buf
    acc_b = TB * tl * 4
    temps = 6 * TB * lc * HC * 4
    vmem = int(1.3 * (2 * x_tile + 2 * small + 2 * io + acc_b + temps))
    vmem = min(max(vmem, 32 * 1024 * 1024), 64 * 1024 * 1024)

    out = pl.pallas_call(
        functools.partial(flatsim_kernel, lc=lc),
        out_shape=jax.ShapeDtypeStruct((B, L), jnp.float32),
        grid=grid,
        in_specs=[
            pl.BlockSpec((TB, tl, HC), lambda b, l, h: (b, l, h)),   # x: streamed
            pl.BlockSpec((TB, HC), lambda b, l, h: (b, h)),          # y (L-resident)
            pl.BlockSpec((TB, HC), lambda b, l, h: (b, h)),          # c = w0 + w2*y
            pl.BlockSpec((1, HC), lambda b, l, h: (0, h)),           # w3
            pl.BlockSpec((TB, 1), lambda b, l, h: (b, 0)),           # s = sum(y*w1)+bias
            pl.BlockSpec((TB, tl), lambda b, l, h: (b, l)),          # mask (int8)
        ],
        out_specs=pl.BlockSpec((TB, tl), lambda b, l, h: (b, l)),    # lane-dense output
        scratch_shapes=[pltpu.VMEM((TB, tl), jnp.float32)],          # f32 accumulator
        compiler_params=pltpu.CompilerParams(
            dimension_semantics=("parallel", "parallel", "arbitrary"),
            vmem_limit_bytes=vmem,
        ),
    )(x, y32, c, w3r, s, mask_i8)

    return out


def flatsim_v2_ref(x, y, x_mask, weight, bias):
    """Pure-JAX reference mirroring the PyTorch forward exactly (f32, full precision)."""
    B, L, H = x.shape
    x32 = x.astype(jnp.float32)
    yb = jnp.broadcast_to(y.astype(jnp.float32)[:, None, :], (B, L, H))
    flat_x = jnp.concatenate([x32, yb, x32 * yb, jnp.abs(x32 - yb)], axis=2)
    flat_x = flat_x.reshape(B * L, 4 * H)
    flat_scores = jnp.dot(flat_x, weight.T.astype(jnp.float32),
                          precision=jax.lax.Precision.HIGHEST) + bias.astype(jnp.float32)
    scores = flat_scores.reshape(B, L)
    return jnp.where(x_mask, -jnp.inf, scores)


def _check(out, ref, atol, rtol):
    finite = jnp.isfinite(ref)
    assert bool(jnp.all(jnp.isfinite(out) == finite)), "mask / -inf mismatch"
    assert bool(jnp.allclose(jnp.where(finite, out, 0.0), jnp.where(finite, ref, 0.0),
                             atol=atol, rtol=rtol)), "value mismatch"


if __name__ == "__main__":
    # --- small smoke test (single-tile grid), x_size == y_size == H, Linear(4H -> 1) ---
    B, L, H = 2, 8, 32
    kx, ky, kw, kb, km = jax.random.split(jax.random.PRNGKey(0), 5)
    x = jax.random.normal(kx, (B, L, H), dtype=jnp.float32)
    y = jax.random.normal(ky, (B, H), dtype=jnp.float32)
    bound = 1.0 / (4 * H) ** 0.5                       # nn.Linear(4H, 1) default init
    weight = jax.random.uniform(kw, (1, 4 * H), minval=-bound, maxval=bound, dtype=jnp.float32)
    bias = jax.random.uniform(kb, (1,), minval=-bound, maxval=bound, dtype=jnp.float32)
    x_mask = jax.random.bernoulli(km, p=0.25, shape=(B, L))     # True == masked

    out = jax.block_until_ready(flatsim_v2(x, y, x_mask, weight, bias))
    _check(out, flatsim_v2_ref(x, y, x_mask, weight, bias), atol=1e-5, rtol=1e-5)

    # bf16 streaming only when the producer already emits bf16 (no wrapper cast pass).
    out_bf16 = jax.block_until_ready(
        flatsim_v2(x.astype(jnp.bfloat16), y, x_mask, weight, bias))
    _check(out_bf16, flatsim_v2_ref(x, y, x_mask, weight, bias), atol=5e-2, rtol=5e-2)

    # --- multi-tile test: B tail (10 vs TB=8), L tail (300 vs tl=128), multiple L
    #     tiles (y/c residency), and H split across the grid (768 -> 2 x 384). -------
    B2, L2, H2 = 10, 300, 768
    kx2, ky2, kw2, kb2, km2 = jax.random.split(jax.random.PRNGKey(1), 5)
    x2 = jax.random.normal(kx2, (B2, L2, H2), dtype=jnp.float32)
    y2 = jax.random.normal(ky2, (B2, H2), dtype=jnp.float32)
    bound2 = 1.0 / (4 * H2) ** 0.5
    weight2 = jax.random.uniform(kw2, (1, 4 * H2), minval=-bound2, maxval=bound2,
                                 dtype=jnp.float32)
    bias2 = jax.random.uniform(kb2, (1,), minval=-bound2, maxval=bound2, dtype=jnp.float32)
    x_mask2 = jax.random.bernoulli(km2, p=0.25, shape=(B2, L2))

    out2 = jax.block_until_ready(flatsim_v2(x2, y2, x_mask2, weight2, bias2, tl=128))
    _check(out2, flatsim_v2_ref(x2, y2, x_mask2, weight2, bias2), atol=1e-4, rtol=1e-4)

    print("KERNEL_OK")
</pallas_src>

<mosaic_0001>
module attributes {stable_mosaic.version = 11 : i64} {
  func.func @flatsim_kernel(%arg0: i32, %arg1: i32, %arg2: i32, %arg3: memref<2x8x32xf32, #tpu.memory_space<vmem>>, %arg4: memref<2x32xf32, #tpu.memory_space<vmem>>, %arg5: memref<2x32xf32, #tpu.memory_space<vmem>>, %arg6: memref<1x32xf32, #tpu.memory_space<vmem>>, %arg7: memref<2x1xf32, #tpu.memory_space<vmem>>, %arg8: memref<2x8xi8, #tpu.memory_space<vmem>>, %arg9: memref<2x8xf32, #tpu.memory_space<vmem>>, %arg10: memref<2x8xf32, #tpu.memory_space<vmem>>) attributes {dimension_semantics = [#tpu.dimension_semantics<parallel>, #tpu.dimension_semantics<parallel>, #tpu.dimension_semantics<arbitrary>], iteration_bounds = array<i64: 1, 1, 1>, scalar_prefetch = 0 : i64, scratch_operands = 1 : i64, tpu.core_type = #tpu.core_type<tc>, window_params = [{transform_indices = @transform_0, window_bounds = array<i64: 2, 8, 32>}, {transform_indices = @transform_1, window_bounds = array<i64: 2, 32>}, {transform_indices = @transform_2, window_bounds = array<i64: 2, 32>}, {transform_indices = @transform_3, window_bounds = array<i64: 1, 32>}, {transform_indices = @transform_4, window_bounds = array<i64: 2, 1>}, {transform_indices = @transform_5, window_bounds = array<i64: 2, 8>}, {transform_indices = @transform_6, window_bounds = array<i64: 2, 8>}]} {
    %c0_i32 = arith.constant 0 : i32
    %0 = arith.cmpi eq, %arg2, %c0_i32 : i32
    %1 = arith.extui %0 : i1 to i32
    %c0_i32_0 = arith.constant 0 : i32
    %2 = arith.cmpi ne, %1, %c0_i32_0 : i32
    scf.if %2 {
      %cst_15 = arith.constant 0.000000e+00 : f32
      %25 = vector.broadcast %cst_15 : f32 to vector<2x8xf32>
      %c0_16 = arith.constant 0 : index
      %c0_17 = arith.constant 0 : index
      %26 = vector.load %arg10[%c0_16, %c0_17] : memref<2x8xf32, #tpu.memory_space<vmem>>, vector<2x8xf32>
      tpu.vector_store %arg10[%c0_16, %c0_17], %25 {strides = array<i32>} : memref<2x8xf32, #tpu.memory_space<vmem>>, vector<2x8xf32>,
    } else {
    }
    %c0 = arith.constant 0 : index
    %c0_1 = arith.constant 0 : index
    %3 = vector.load %arg4[%c0, %c0_1] : memref<2x32xf32, #tpu.memory_space<vmem>>, vector<2x32xf32>
    %4 = vector.shape_cast %3 : vector<2x32xf32> to vector<2x1x32xf32>
    %c0_2 = arith.constant 0 : index
    %c0_3 = arith.constant 0 : index
    %5 = vector.load %arg5[%c0_2, %c0_3] : memref<2x32xf32, #tpu.memory_space<vmem>>, vector<2x32xf32>
    %6 = vector.shape_cast %5 : vector<2x32xf32> to vector<2x1x32xf32>
    %c0_4 = arith.constant 0 : index
    %c0_5 = arith.constant 0 : index
    %7 = vector.load %arg6[%c0_4, %c0_5] : memref<1x32xf32, #tpu.memory_space<vmem>>, vector<1x32xf32>
    %8 = vector.shape_cast %7 : vector<1x32xf32> to vector<1x1x32xf32>
    %c0_6 = arith.constant 0 : index
    %c0_7 = arith.constant 0 : index
    %c0_8 = arith.constant 0 : index
    %9 = vector.load %arg3[%c0_6, %c0_7, %c0_8] : memref<2x8x32xf32, #tpu.memory_space<vmem>>, vector<2x8x32xf32>
    %10 = vector.broadcast %6 : vector<2x1x32xf32> to vector<2x8x32xf32>
    %11 = arith.mulf %9, %10 : vector<2x8x32xf32>
    %12 = vector.broadcast %4 : vector<2x1x32xf32> to vector<2x8x32xf32>
    %13 = arith.subf %9, %12 : vector<2x8x32xf32>
    %14 = math.absf %13 : vector<2x8x32xf32>
    %15 = vector.broadcast %8 : vector<1x1x32xf32> to vector<2x8x32xf32>
    %16 = arith.mulf %14, %15 : vector<2x8x32xf32>
    %17 = arith.addf %11, %16 : vector<2x8x32xf32>
    %c0_9 = arith.constant 0 : index
    %c0_10 = arith.constant 0 : index
    %18 = vector.load %arg10[%c0_9, %c0_10] : memref<2x8xf32, #tpu.memory_space<vmem>>, vector<2x8xf32>
    %cst = arith.constant dense<0.000000e+00> : vector<2x8xf32>
    %19 = vector.multi_reduction <add>, %17, %cst [2] : vector<2x8x32xf32> to vector<2x8xf32>
    %20 = arith.addf %18, %19 : vector<2x8xf32>
    %c0_11 = arith.constant 0 : index
    %c0_12 = arith.constant 0 : index
    %21 = vector.load %arg10[%c0_11, %c0_12] : memref<2x8xf32, #tpu.memory_space<vmem>>, vector<2x8xf32>
    tpu.vector_store %arg10[%c0_11, %c0_12], %20 {strides = array<i32>} : memref<2x8xf32, #tpu.memory_space<vmem>>, vector<2x8xf32>,
    %c0_i32_13 = arith.constant 0 : i32
    %22 = arith.cmpi eq, %arg2, %c0_i32_13 : i32
    %23 = arith.extui %22 : i1 to i32
    %c0_i32_14 = arith.constant 0 : i32
    %24 = arith.cmpi ne, %23, %c0_i32_14 : i32
    scf.if %24 {
      %c0_15 = arith.constant 0 : index
      %c0_16 = arith.constant 0 : index
      %25 = vector.load %arg10[%c0_15, %c0_16] : memref<2x8xf32, #tpu.memory_space<vmem>>, vector<2x8xf32>
      %c0_17 = arith.constant 0 : index
      %c0_18 = arith.constant 0 : index
      %26 = vector.load %arg7[%c0_17, %c0_18] : memref<2x1xf32, #tpu.memory_space<vmem>>, vector<2x1xf32>
      %27 = vector.broadcast %26 : vector<2x1xf32> to vector<2x8xf32>
      %28 = arith.addf %25, %27 : vector<2x8xf32>
      %c0_19 = arith.constant 0 : index
      %c0_20 = arith.constant 0 : index
      %29 = vector.load %arg8[%c0_19, %c0_20] : memref<2x8xi8, #tpu.memory_space<vmem>>, vector<2x8xi8>
      %c0_i8 = arith.constant 0 : i8
      %30 = vector.broadcast %c0_i8 : i8 to vector<2x8xi8>
      %31 = arith.cmpi ne, %29, %30 : vector<2x8xi8>
      %cst_21 = arith.constant 0xFF800000 : f32
      %32 = vector.broadcast %cst_21 : f32 to vector<2x8xf32>
      %33 = arith.select %31, %32, %28 : vector<2x8xi1>, vector<2x8xf32>
      %c0_22 = arith.constant 0 : index
      %c0_23 = arith.constant 0 : index
      %34 = vector.load %arg9[%c0_22, %c0_23] : memref<2x8xf32, #tpu.memory_space<vmem>>, vector<2x8xf32>
      tpu.vector_store %arg9[%c0_22, %c0_23], %33 {strides = array<i32>} : memref<2x8xf32, #tpu.memory_space<vmem>>, vector<2x8xf32>,
    } else {
    }
    return
  }
  func.func @transform_0(%arg0: i32, %arg1: i32, %arg2: i32) -> (i32, i32, i32) {
    %c0_i32 = arith.constant 0 : i32
    return %arg0, %arg1, %arg2 : i32, i32, i32
  }
  func.func @transform_1(%arg0: i32, %arg1: i32, %arg2: i32) -> (i32, i32) {
    %c0_i32 = arith.constant 0 : i32
    return %arg0, %arg2 : i32, i32
  }
  func.func @transform_2(%arg0: i32, %arg1: i32, %arg2: i32) -> (i32, i32) {
    %c0_i32 = arith.constant 0 : i32
    return %arg0, %arg2 : i32, i32
  }
  func.func @transform_3(%arg0: i32, %arg1: i32, %arg2: i32) -> (i32, i32) {
    %c0_i32 = arith.constant 0 : i32
    %c0_i32_0 = arith.constant 0 : i32
    return %c0_i32, %arg2 : i32, i32
  }
  func.func @transform_4(%arg0: i32, %arg1: i32, %arg2: i32) -> (i32, i32) {
    %c0_i32 = arith.constant 0 : i32
    %c0_i32_0 = arith.constant 0 : i32
    return %arg0, %c0_i32 : i32, i32
  }
  func.func @transform_5(%arg0: i32, %arg1: i32, %arg2: i32) -> (i32, i32) {
    %c0_i32 = arith.constant 0 : i32
    return %arg0, %arg1 : i32, i32
  }
  func.func @transform_6(%arg0: i32, %arg1: i32, %arg2: i32) -> (i32, i32) {
    %c0_i32 = arith.constant 0 : i32
    return %arg0, %arg1 : i32, i32
  }
}

</mosaic_0001>

<bundles_post_ra>
// kernel: flatsim_v2.1
= control target key start
LH: loop header
LB: loop body
LE: loop exit
PB: predicated region body
PF: predicated region fallthrough
CT: control target
= control target key end

     0   :  { %v148_v10 = vmov 0   ;;  %s213_s0 = inlined_call_operand.vmem [shape: f32[2,8,32], index: 0, kind: input, shape index: {}]   ;;  %s214_s1 = inlined_call_operand.vmem [shape: f32[2,32], index: 1, kind: input, shape index: {}]   ;;  %s215_s2 = inlined_call_operand.vmem [shape: f32[2,32], index: 2, kind: input, shape index: {}]   ;;  %s216_s3 = inlined_call_operand.vmem [shape: f32[1,32], index: 3, kind: input, shape index: {}]   ;;  %s217_s4 = inlined_call_operand.vmem [shape: f32[2,1], index: 4, kind: input, shape index: {}]   ;;  %s218_s5 = inlined_call_operand.vmem [shape: s8[2,8], index: 5, kind: input, shape index: {}]   ;;  %s219_s6 = inlined_call_operand.hbm [shape: f32[2,8], index: 6, kind: output, shape index: {}]  }
   0x1   :  { %v32_v0 = vld [vmem:[%s214_s1] sm:$0x3]  ;;  %v40_v9 = vld [vmem:[%s213_s0 + $0x8] sm:$0xff]  ;;  %119 = vset.pattern.permute.xlu1 %v148_v10  ;;  %120 = vset.pattern.permute.xlu0 %v148_v10 }
   0x2   :  { %v35_v1 = vld [vmem:[%s215_s2] sm:$0x3]  ;;  %v47_v4 = vperm.slane %v32_v0, 0  ;;  %v34_v6 = vrot.slane %v32_v0, 1 }
   0x3   :  { %v39_v2 = vld [vmem:[%s213_s0] sm:$0xff]  ;;  %v41_v3 = vperm.slane %v35_v1, 0  ;;  %v37_v7 = vrot.slane %v35_v1, 1 }
   0x4   :  { %v121_v5 = vld [vmem:[%s216_s3] ss:$0 sm:$0xff]  ;;  %v51_v8 = vsub.f32 %v39_v2, %v47_v4 }
   0x5   :  { %v86_v11 = vld [vmem:[%s217_s4] sm:$0x3] }
   0x6   :  { %11 = vsyncpa [#allocation4], 0  ;;  %v48_v12 = vperm.slane %v34_v6, 0  ;;  %89 = vperm.xlu1 %119, %v86_v11   ;;  %v45_v13 = vmul.f32 %v41_v3, %v39_v2  ;;  %v53_v14 = vand.u32 2147483647, %v51_v8  ;;  %v42_v15 = vperm.slane %v37_v7, 0 }
   0x7   :  { %vm63_vm0 = vcmask 261120   ;;  %vm30_vm1 = vcmask 58368   ;;  %v149_v25 = vmov 0.0   ;;  %v72_v27 = vlaneseq  ;;  %v93_v29 = vld [vmem:[%s218_s5] sm:$0x1]  ;;  %s150_s4 = smov [#allocation3]  }
   0x8   :  { %v52_v16 = vsub.f32 %v40_v9, %v48_v12  ;;  %v58_v17 = vmul.f32 %v121_v5, %v53_v14  ;;  %v46_v20 = vmul.f32 %v42_v15, %v40_v9  ;;  %31 = vst.msk [vmem:[#allocation2] sm:$0x3] %vm30_vm1, %v149_v25  ;;  %vm76_vm2 = vcmask 1041409   ;;  %s105_s7 = sshll.u32 %s150_s4, 4  ;;  %s107_s10 = sshll.u32 %s219_s6, 4  ;;  %s106_s7 = int_to_ptr.vmem [resolvable:$true] %s105_s7  ;;  %s108_s10 = int_to_ptr.hbm [resolvable:$true] %s107_s10 }
   0x9   :  { %v73_v28 = vand.u32 127, %v72_v27  ;;  %vm94_vm3 = vnez %v93_v29 }
   0xa   :  { %v54_v18 = vand.u32 2147483647, %v52_v16  ;;  %v60_v19 = vadd.f32 %v58_v17, %v45_v13  ;;  %v95_v36 = vsel %vm94_vm3, 16843009, %v148_v10 }
   0xb   :  { %v96_v37 = vunpack.c.0.s8 %v95_v36 }
   0xc   :  { %v59_v21 = vmul.f32 %v121_v5, %v54_v18  ;;  %v64_v22 = vsel %vm63_vm0, %v60_v19, 0.0 }
   0xd   :  { %65 = vadd.xlane.f32.xlu0 %v64_v22  ;;  %vm97_vm4 = vcmp.ne.s32.totalorder %v96_v37, 0 }
   0xe   :  { %v61_v23 = vadd.f32 %v59_v21, %v46_v20 }
   0xf   :  { %v62_v33 = vld [vmem:[#allocation2] sm:$0x3] }
  0x10   :  { %v67_v24 = vsel %vm63_vm0, %v61_v23, 0.0 }
  0x15   :  { %68 = vadd.xlane.f32.xlu0 %v67_v24 }
  0x78   :  { %v90_v38 = vpop.permute.xlu1 %89 }
  0x80   :  { %v66_v26 = vpop.xlane.xlu0 %65 }
  0x81   :  { %v74_v31 = vperm.slane %v66_v26, %v73_v28 }
  0x88   :  { %v69_v30 = vpop.xlane.xlu0 %68 }
  0x89   :  { %v75_v32 = vperm.slane %v69_v30, %v73_v28 }
  0x8b   :  { %v77_v34 = vsel %vm76_vm2, %v75_v32, %v74_v31 }
  0x8c   :  { %v79_v35 = vadd.f32 %v77_v34, %v62_v33 }
  0x8e   :  { %81 = vst.msk [vmem:[#allocation2] sm:$0x3] %vm30_vm1, %v79_v35 }
  0x95   :  { %v85_v39 = vld [vmem:[#allocation2] sm:$0x3] }
  0x96   :  { %v92_v40 = vadd.f32 %v90_v38, %v85_v39 }
  0x98   :  { %v98_v41 = vsel %vm97_vm4, -inf, %v92_v40 }
  0x99   :  { %99 = vst.msk [vmem:[#allocation3] sm:$0x3] %vm30_vm1, %v98_v41 }
  0x9a   :  { %110 = dma.vmem_to_hbm [thread:$0]  %s106_s7, 32, %s108_s10, [#allocation4]  }
  0x9b   :  { %146 = dma.done.wait [#allocation4], 32  }
  0x9c   :  { %147 = vsyncadd [#allocation4], 4294967264 }
  0x9d   :  { %115 = vsyncpa [#allocation4], 1 }

</bundles_post_ra>
